<compile_context>
chip_gen: v5e
topology: v5e:2x2
jax: 0.10.0
libtpu: 0.0.40
codegen_flags: <defaults>
</compile_context>

<pallas_src>
import functools

import numpy as np
import jax
import jax.numpy as jnp
from jax.experimental import pallas as pl
from jax.experimental.pallas import tpu as pltpu


def _triplet_kernel(nT_ref, nTs_ref, nR_ref, nRi_ref, valid_ref,   # SMEM scalar prefetch
                    t_ref, ts_ref, im_ref,                          # VMEM tiles
                    out_ref, *, margin, simtype):
    BB, N, _ = t_ref.shape
    L2 = im_ref.shape[2]            # 2*L : [anchor image | impostor image]
    L = L2 // 2

    T = t_ref[...]                  # (BB, N, D)   bf16 anchor text
    Ts = ts_ref[...]                # (BB, N, D)   bf16 impostor text
    Icat = im_ref[...]              # (BB, D, 2L)  bf16 anchor||impostor image, D-leading

    # Two fused, batched MXU matmuls (instead of 3*BB tiny ones). Image operand
    # is already (D, 2L) so no in-kernel XLU transpose is required.
    M1 = jnp.einsum('bnd,bdl->bnl', T, Icat,
                    preferred_element_type=jnp.float32)    # (BB, N, 2L)
    M2 = jnp.einsum('bnd,bdl->bnl', Ts, Icat,
                    preferred_element_type=jnp.float32)    # (BB, N, 2L)

    # Iotas hoisted out of the per-item loop; masks are just compares against
    # SMEM scalars (no mask DMA streams, no in-kernel mask-sum reductions).
    row_iota = jax.lax.broadcasted_iota(jnp.int32, (N, 1), 0)
    col_iota = jax.lax.broadcasted_iota(jnp.int32, (1, L2), 1)

    def similarity(M, tmask, cmask, n_tok, n_reg):
        if simtype == 'mean':
            both = jnp.logical_and(tmask, cmask)
            s = jnp.sum(jnp.where(both, M, 0.0), axis=1, keepdims=True)       # (N,1)
            s = jnp.sum(s, axis=0, keepdims=True)                              # (1,1)
            return s / (n_tok * n_reg)
        elif simtype == 'mean_max':
            Mm = jnp.where(cmask, M, -3.0e38)
            row_max = jnp.max(Mm, axis=1, keepdims=True)                       # (N,1)
            s = jnp.sum(jnp.where(tmask, row_max, 0.0), axis=0, keepdims=True)  # (1,1)
            return s / n_tok
        elif simtype == 'max_mean':
            Mm = jnp.where(tmask, M, -3.0e38)
            col_max = jnp.max(Mm, axis=0, keepdims=True)                       # (1,2L)
            s = jnp.sum(jnp.where(cmask, col_max, 0.0), axis=1, keepdims=True)  # (1,1)
            return s / n_reg
        else:
            raise ValueError(f'unknown simtype: {simtype}')

    base = pl.program_id(0) * BB
    total = jnp.zeros((1, 1), jnp.float32)

    for b in range(BB):                       # static unroll, BB is small
        idx = base + b
        nT_b = nT_ref[idx]
        nTs_b = nTs_ref[idx]
        nR_b = nR_ref[idx]
        nRi_b = nRi_ref[idx]
        v_b = valid_ref[idx].astype(jnp.float32)

        tmask = row_iota < nT_b                                   # (N,1)  anchor tokens
        tmask_s = row_iota < nTs_b                                # (N,1)  impostor tokens
        cmask_a = col_iota < nR_b                                 # (1,2L) anchor regions [0,nR)
        cmask_i = jnp.logical_and(col_iota >= L, col_iota < L + nRi_b)  # impostor regions

        nT_f = nT_b.astype(jnp.float32)
        nTs_f = nTs_b.astype(jnp.float32)
        nR_f = nR_b.astype(jnp.float32)
        nRi_f = nRi_b.astype(jnp.float32)

        M1b = M1[b]                                               # (N, 2L)
        M2b = M2[b]

        anchorsim = similarity(M1b, tmask, cmask_a, nT_f, nR_f)
        Iimpsim = similarity(M1b, tmask, cmask_i, nT_f, nRi_f)
        Simpsim = similarity(M2b, tmask_s, cmask_a, nTs_f, nR_f)

        s2i = margin + Iimpsim - anchorsim
        i2s = margin + Simpsim - anchorsim
        contrib = jnp.maximum(s2i, 0.0) + jnp.maximum(i2s, 0.0)
        total = total + contrib * v_b                             # padded items -> v_b == 0

    out_ref[...] = total.reshape(1, 1, 1)


def _make_impostor_indices(B, seed=0):
    """Host-side deterministic equivalent of the np.random impostor sampling."""
    rng = np.random.RandomState(seed)
    I_imp = np.zeros(B, np.int32)
    S_imp = np.zeros(B, np.int32)
    for i in range(B):
        a = i
        while a == i:
            a = rng.randint(0, B)
        b = i
        while b == i:
            b = rng.randint(0, B)
        I_imp[i] = a
        S_imp[i] = b
    return S_imp, I_imp


def triplet_loss(text_outputs, image_outputs, text_mask, image_mask,
                 margin=1.0, simtype='mean_max', seed=0, block_b=8):
    B, N, D = text_outputs.shape
    L = image_outputs.shape[1]
    if B == 1:
        return jnp.zeros((1,), jnp.float32)

    # TODO(synk): the PyTorch module resamples impostors with np.random every
    # forward; here sampling is host-side with a fixed seed (deterministic).
    S_imp, I_imp = _make_impostor_indices(B, seed)
    S_imp = jnp.asarray(S_imp)
    I_imp = jnp.asarray(I_imp)

    nT = jnp.sum(text_mask, axis=1).astype(jnp.int32)          # (B,)
    nR = jnp.sum(image_mask, axis=1).astype(jnp.int32)         # (B,)
    nTs = jnp.take(nT, S_imp, axis=0)
    nRi = jnp.take(nR, I_imp, axis=0)

    # bf16 streams (kernel accumulates in f32 on the MXU).
    t = text_outputs.astype(jnp.bfloat16)
    im = image_outputs.astype(jnp.bfloat16)

    # Pre-gather impostor streams so all tensor inputs are sequential; fuse the
    # anchor and impostor images into one D-leading operand (B, D, 2L).
    t_s = jnp.take(t, S_imp, axis=0)                                          # (B, N, D)
    im_cat = jnp.concatenate([im, jnp.take(im, I_imp, axis=0)], axis=1)       # (B, 2L, D)
    im_cat = jnp.swapaxes(im_cat, 1, 2)                                       # (B, D, 2L)

    BB = max(1, min(block_b, B))
    n_blocks = pl.cdiv(B, BB)
    B_pad = n_blocks * BB
    pad = B_pad - B

    valid = jnp.concatenate(
        [jnp.ones((B,), jnp.int32), jnp.zeros((pad,), jnp.int32)])
    if pad:
        t = jnp.pad(t, ((0, pad), (0, 0), (0, 0)))
        t_s = jnp.pad(t_s, ((0, pad), (0, 0), (0, 0)))
        im_cat = jnp.pad(im_cat, ((0, pad), (0, 0), (0, 0)))
        ones = jnp.ones((pad,), jnp.int32)
        nT = jnp.concatenate([nT, ones])
        nTs = jnp.concatenate([nTs, ones])
        nR = jnp.concatenate([nR, ones])
        nRi = jnp.concatenate([nRi, ones])

    kernel = functools.partial(_triplet_kernel, margin=float(margin),
                               simtype=simtype)

    per_block = pl.pallas_call(
        kernel,
        out_shape=jax.ShapeDtypeStruct((n_blocks, 1, 1), jnp.float32),
        grid_spec=pltpu.PrefetchScalarGridSpec(
            num_scalar_prefetch=5,
            grid=(n_blocks,),
            in_specs=[
                pl.BlockSpec((BB, N, D), lambda i, *_: (i, 0, 0)),       # anchor text
                pl.BlockSpec((BB, N, D), lambda i, *_: (i, 0, 0)),       # impostor text
                pl.BlockSpec((BB, D, 2 * L), lambda i, *_: (i, 0, 0)),   # anchor||impostor image
            ],
            out_specs=pl.BlockSpec((1, 1, 1), lambda i, *_: (i, 0, 0)),
        ),
        compiler_params=pltpu.CompilerParams(
            dimension_semantics=("parallel",)),
    )(nT, nTs, nR, nRi, valid, t, t_s, im_cat)

    return (jnp.sum(per_block) / B).reshape(1)


def _reference_loss(t, im, tm, imk, S_imp, I_imp, margin=1.0):
    """Pure-numpy replica of the PyTorch forward (mean_max)."""
    t = np.asarray(t)
    im = np.asarray(im)
    nT = np.asarray(tm).sum(1).astype(int)
    nR = np.asarray(imk).sum(1).astype(int)
    B = t.shape[0]

    def sim(T, I):
        M = T @ I.T
        return M.max(1).mean()

    loss = 0.0
    for i in range(B):
        a = sim(t[i, :nT[i]], im[i, :nR[i]])
        s = sim(t[S_imp[i], :nT[S_imp[i]]], im[i, :nR[i]])
        ii = sim(t[i, :nT[i]], im[I_imp[i], :nR[I_imp[i]]])
        s2i = margin + ii - a
        i2s = margin + s - a
        if s2i > 0:
            loss += s2i
        if i2s > 0:
            loss += i2s
    return loss / B


if __name__ == "__main__":
    key = jax.random.PRNGKey(0)
    B, N, L, D = 4, 8, 8, 32
    k1, k2 = jax.random.split(key)
    text_outputs = jax.random.normal(k1, (B, N, D), dtype=jnp.float32)
    image_outputs = jax.random.normal(k2, (B, L, D), dtype=jnp.float32)

    ntokens = np.array([8, 5, 6, 7])
    nregions = np.array([6, 8, 4, 7])
    text_mask = jnp.asarray((np.arange(N)[None, :] < ntokens[:, None]).astype(np.float32))
    image_mask = jnp.asarray((np.arange(L)[None, :] < nregions[:, None]).astype(np.float32))

    loss = triplet_loss(text_outputs, image_outputs, text_mask, image_mask,
                        margin=1.0, simtype='mean_max', seed=0)
    loss = jax.block_until_ready(loss)

    # Reference uses bf16-rounded embeddings to match the in-kernel bf16 MXU feed.
    S_imp, I_imp = _make_impostor_indices(B, seed=0)
    t_np = np.asarray(text_outputs.astype(jnp.bfloat16).astype(jnp.float32))
    im_np = np.asarray(image_outputs.astype(jnp.bfloat16).astype(jnp.float32))
    ref = _reference_loss(t_np, im_np, text_mask, image_mask, S_imp, I_imp, margin=1.0)
    assert np.allclose(np.asarray(loss)[0], ref, rtol=1e-3, atol=1e-3), (loss, ref)

    print("KERNEL_OK")
</pallas_src>

<mosaic_0001>
module attributes {stable_mosaic.version = 11 : i64} {
  func.func @_triplet_kernel(%arg0: i32, %arg1: memref<4xi32, #tpu.memory_space<smem>>, %arg2: memref<4xi32, #tpu.memory_space<smem>>, %arg3: memref<4xi32, #tpu.memory_space<smem>>, %arg4: memref<4xi32, #tpu.memory_space<smem>>, %arg5: memref<4xi32, #tpu.memory_space<smem>>, %arg6: memref<4x8x32xbf16, #tpu.memory_space<vmem>>, %arg7: memref<4x8x32xbf16, #tpu.memory_space<vmem>>, %arg8: memref<4x32x16xbf16, #tpu.memory_space<vmem>>, %arg9: memref<1x1x1xf32, #tpu.memory_space<vmem>>) attributes {dimension_semantics = [#tpu.dimension_semantics<parallel>], iteration_bounds = array<i64: 1>, scalar_prefetch = 5 : i64, scratch_operands = 0 : i64, tpu.core_type = #tpu.core_type<tc>, window_params = [{transform_indices = @transform_0, window_bounds = array<i64: 4, 8, 32>}, {transform_indices = @transform_1, window_bounds = array<i64: 4, 8, 32>}, {transform_indices = @transform_2, window_bounds = array<i64: 4, 32, 16>}, {transform_indices = @transform_3, window_bounds = array<i64: 1, 1, 1>}]} {
    %c0 = arith.constant 0 : index
    %c0_0 = arith.constant 0 : index
    %c0_1 = arith.constant 0 : index
    %0 = vector.load %arg6[%c0, %c0_0, %c0_1] : memref<4x8x32xbf16, #tpu.memory_space<vmem>>, vector<4x8x32xbf16>
    %c0_2 = arith.constant 0 : index
    %c0_3 = arith.constant 0 : index
    %c0_4 = arith.constant 0 : index
    %1 = vector.load %arg7[%c0_2, %c0_3, %c0_4] : memref<4x8x32xbf16, #tpu.memory_space<vmem>>, vector<4x8x32xbf16>
    %c0_5 = arith.constant 0 : index
    %c0_6 = arith.constant 0 : index
    %c0_7 = arith.constant 0 : index
    %2 = vector.load %arg8[%c0_5, %c0_6, %c0_7] : memref<4x32x16xbf16, #tpu.memory_space<vmem>>, vector<4x32x16xbf16>
    "tpu.trace_start"() <{level = 10 : i32, message = "bnd,bdl->bnl"}> : () -> ()
    %cst = arith.constant dense<0.000000e+00> : vector<4x8x16xf32>
    %3 = tpu.matmul %0, %2, %cst {dimension_numbers = #tpu.dot_dimension_numbers<[2], [1], [1], [2], [0, 0, 0, 1, 1, 2], [0], [0]>} : vector<4x8x32xbf16>, vector<4x32x16xbf16>, vector<4x8x16xf32> -> vector<4x8x16xf32>
    %cst_8 = arith.constant dense<0.000000e+00> : vector<4x8x16xf32>
    %4 = tpu.matmul %1, %2, %cst_8 {dimension_numbers = #tpu.dot_dimension_numbers<[2], [1], [1], [2], [0, 0, 0, 1, 1, 2], [0], [0]>} : vector<4x8x32xbf16>, vector<4x32x16xbf16>, vector<4x8x16xf32> -> vector<4x8x16xf32>
    "tpu.trace_stop"() : () -> ()
    %5 = tpu.iota {dimensions = array<i32: 0>} : vector<8x1xi32>
    %6 = tpu.iota {dimensions = array<i32: 1>} : vector<1x16xi32>
    %c4_i32 = arith.constant 4 : i32
    %7 = arith.muli %arg0, %c4_i32 : i32
    %cst_9 = arith.constant 0.000000e+00 : f32
    %8 = vector.broadcast %cst_9 : f32 to vector<1x1xf32>
    %c0_i32 = arith.constant 0 : i32
    %9 = arith.addi %7, %c0_i32 : i32
    %10 = arith.index_cast %9 : i32 to index
    %11 = memref.load %arg1[%10] : memref<4xi32, #tpu.memory_space<smem>>
    %12 = arith.index_cast %9 : i32 to index
    %13 = memref.load %arg2[%12] : memref<4xi32, #tpu.memory_space<smem>>
    %14 = arith.index_cast %9 : i32 to index
    %15 = memref.load %arg3[%14] : memref<4xi32, #tpu.memory_space<smem>>
    %16 = arith.index_cast %9 : i32 to index
    %17 = memref.load %arg4[%16] : memref<4xi32, #tpu.memory_space<smem>>
    %18 = arith.index_cast %9 : i32 to index
    %19 = memref.load %arg5[%18] : memref<4xi32, #tpu.memory_space<smem>>
    %20 = arith.sitofp %19 : i32 to f32
    %21 = vector.broadcast %11 : i32 to vector<8x1xi32>
    %22 = arith.cmpi slt, %5, %21 : vector<8x1xi32>
    %23 = vector.broadcast %13 : i32 to vector<8x1xi32>
    %24 = arith.cmpi slt, %5, %23 : vector<8x1xi32>
    %25 = vector.broadcast %15 : i32 to vector<1x16xi32>
    %26 = arith.cmpi slt, %6, %25 : vector<1x16xi32>
    %c8_i32 = arith.constant 8 : i32
    %27 = vector.broadcast %c8_i32 : i32 to vector<1x16xi32>
    %28 = arith.cmpi sge, %6, %27 : vector<1x16xi32>
    %c8_i32_10 = arith.constant 8 : i32
    %29 = arith.addi %c8_i32_10, %17 : i32
    %30 = vector.broadcast %29 : i32 to vector<1x16xi32>
    %31 = arith.cmpi slt, %6, %30 : vector<1x16xi32>
    %32 = arith.andi %28, %31 : vector<1x16xi1>
    %33 = arith.sitofp %11 : i32 to f32
    %34 = arith.sitofp %13 : i32 to f32
    %35 = vector.extract_strided_slice %3 {offsets = [0, 0, 0], sizes = [1, 8, 16], strides = [1, 1, 1]} : vector<4x8x16xf32> to vector<1x8x16xf32>
    %36 = vector.shape_cast %35 : vector<1x8x16xf32> to vector<8x16xf32>
    %37 = vector.extract_strided_slice %4 {offsets = [0, 0, 0], sizes = [1, 8, 16], strides = [1, 1, 1]} : vector<4x8x16xf32> to vector<1x8x16xf32>
    %38 = vector.shape_cast %37 : vector<1x8x16xf32> to vector<8x16xf32>
    %cst_11 = arith.constant -3.000000e+38 : f32
    %39 = vector.shape_cast %26 : vector<1x16xi1> to vector<1x16xi1>
    %40 = vector.broadcast %39 : vector<1x16xi1> to vector<8x16xi1>
    %41 = vector.broadcast %cst_11 : f32 to vector<8x16xf32>
    %42 = arith.select %40, %36, %41 : vector<8x16xi1>, vector<8x16xf32>
    %cst_12 = arith.constant dense<0xFF800000> : vector<8xf32>
    %43 = vector.multi_reduction <maximumf>, %42, %cst_12 [1] : vector<8x16xf32> to vector<8xf32>
    %44 = vector.shape_cast %43 : vector<8xf32> to vector<8x1xf32>
    %cst_13 = arith.constant 0.000000e+00 : f32
    %45 = vector.broadcast %cst_13 : f32 to vector<8x1xf32>
    %46 = arith.select %22, %44, %45 : vector<8x1xi1>, vector<8x1xf32>
    %cst_14 = arith.constant dense<0.000000e+00> : vector<1xf32>
    %47 = vector.multi_reduction <add>, %46, %cst_14 [0] : vector<8x1xf32> to vector<1xf32>
    %48 = vector.shape_cast %47 : vector<1xf32> to vector<1x1xf32>
    %49 = vector.broadcast %33 : f32 to vector<1x1xf32>
    %50 = arith.divf %48, %49 : vector<1x1xf32>
    %cst_15 = arith.constant -3.000000e+38 : f32
    %51 = vector.shape_cast %32 : vector<1x16xi1> to vector<1x16xi1>
    %52 = vector.broadcast %51 : vector<1x16xi1> to vector<8x16xi1>
    %53 = vector.broadcast %cst_15 : f32 to vector<8x16xf32>
    %54 = arith.select %52, %36, %53 : vector<8x16xi1>, vector<8x16xf32>
    %cst_16 = arith.constant dense<0xFF800000> : vector<8xf32>
    %55 = vector.multi_reduction <maximumf>, %54, %cst_16 [1] : vector<8x16xf32> to vector<8xf32>
    %56 = vector.shape_cast %55 : vector<8xf32> to vector<8x1xf32>
    %cst_17 = arith.constant 0.000000e+00 : f32
    %57 = vector.broadcast %cst_17 : f32 to vector<8x1xf32>
    %58 = arith.select %22, %56, %57 : vector<8x1xi1>, vector<8x1xf32>
    %cst_18 = arith.constant dense<0.000000e+00> : vector<1xf32>
    %59 = vector.multi_reduction <add>, %58, %cst_18 [0] : vector<8x1xf32> to vector<1xf32>
    %60 = vector.shape_cast %59 : vector<1xf32> to vector<1x1xf32>
    %61 = vector.broadcast %33 : f32 to vector<1x1xf32>
    %62 = arith.divf %60, %61 : vector<1x1xf32>
    %cst_19 = arith.constant -3.000000e+38 : f32
    %63 = vector.shape_cast %26 : vector<1x16xi1> to vector<1x16xi1>
    %64 = vector.broadcast %63 : vector<1x16xi1> to vector<8x16xi1>
    %65 = vector.broadcast %cst_19 : f32 to vector<8x16xf32>
    %66 = arith.select %64, %38, %65 : vector<8x16xi1>, vector<8x16xf32>
    %cst_20 = arith.constant dense<0xFF800000> : vector<8xf32>
    %67 = vector.multi_reduction <maximumf>, %66, %cst_20 [1] : vector<8x16xf32> to vector<8xf32>
    %68 = vector.shape_cast %67 : vector<8xf32> to vector<8x1xf32>
    %cst_21 = arith.constant 0.000000e+00 : f32
    %69 = vector.broadcast %cst_21 : f32 to vector<8x1xf32>
    %70 = arith.select %24, %68, %69 : vector<8x1xi1>, vector<8x1xf32>
    %cst_22 = arith.constant dense<0.000000e+00> : vector<1xf32>
    %71 = vector.multi_reduction <add>, %70, %cst_22 [0] : vector<8x1xf32> to vector<1xf32>
    %72 = vector.shape_cast %71 : vector<1xf32> to vector<1x1xf32>
    %73 = vector.broadcast %34 : f32 to vector<1x1xf32>
    %74 = arith.divf %72, %73 : vector<1x1xf32>
    %cst_23 = arith.constant 1.000000e+00 : f32
    %75 = vector.broadcast %cst_23 : f32 to vector<1x1xf32>
    %76 = arith.addf %75, %62 : vector<1x1xf32>
    %77 = arith.subf %76, %50 : vector<1x1xf32>
    %cst_24 = arith.constant 1.000000e+00 : f32
    %78 = vector.broadcast %cst_24 : f32 to vector<1x1xf32>
    %79 = arith.addf %78, %74 : vector<1x1xf32>
    %80 = arith.subf %79, %50 : vector<1x1xf32>
    %cst_25 = arith.constant 0.000000e+00 : f32
    %81 = vector.broadcast %cst_25 : f32 to vector<1x1xf32>
    %82 = arith.maximumf %77, %81 : vector<1x1xf32>
    %cst_26 = arith.constant 0.000000e+00 : f32
    %83 = vector.broadcast %cst_26 : f32 to vector<1x1xf32>
    %84 = arith.maximumf %80, %83 : vector<1x1xf32>
    %85 = arith.addf %82, %84 : vector<1x1xf32>
    %86 = vector.broadcast %20 : f32 to vector<1x1xf32>
    %87 = arith.mulf %85, %86 : vector<1x1xf32>
    %88 = arith.addf %8, %87 : vector<1x1xf32>
    %c1_i32 = arith.constant 1 : i32
    %89 = arith.addi %7, %c1_i32 : i32
    %90 = arith.index_cast %89 : i32 to index
    %91 = memref.load %arg1[%90] : memref<4xi32, #tpu.memory_space<smem>>
    %92 = arith.index_cast %89 : i32 to index
    %93 = memref.load %arg2[%92] : memref<4xi32, #tpu.memory_space<smem>>
    %94 = arith.index_cast %89 : i32 to index
    %95 = memref.load %arg3[%94] : memref<4xi32, #tpu.memory_space<smem>>
    %96 = arith.index_cast %89 : i32 to index
    %97 = memref.load %arg4[%96] : memref<4xi32, #tpu.memory_space<smem>>
    %98 = arith.index_cast %89 : i32 to index
    %99 = memref.load %arg5[%98] : memref<4xi32, #tpu.memory_space<smem>>
    %100 = arith.sitofp %99 : i32 to f32
    %101 = vector.broadcast %91 : i32 to vector<8x1xi32>
    %102 = arith.cmpi slt, %5, %101 : vector<8x1xi32>
    %103 = vector.broadcast %93 : i32 to vector<8x1xi32>
    %104 = arith.cmpi slt, %5, %103 : vector<8x1xi32>
    %105 = vector.broadcast %95 : i32 to vector<1x16xi32>
    %106 = arith.cmpi slt, %6, %105 : vector<1x16xi32>
    %c8_i32_27 = arith.constant 8 : i32
    %107 = vector.broadcast %c8_i32_27 : i32 to vector<1x16xi32>
    %108 = arith.cmpi sge, %6, %107 : vector<1x16xi32>
    %c8_i32_28 = arith.constant 8 : i32
    %109 = arith.addi %c8_i32_28, %97 : i32
    %110 = vector.broadcast %109 : i32 to vector<1x16xi32>
    %111 = arith.cmpi slt, %6, %110 : vector<1x16xi32>
    %112 = arith.andi %108, %111 : vector<1x16xi1>
    %113 = arith.sitofp %91 : i32 to f32
    %114 = arith.sitofp %93 : i32 to f32
    %115 = vector.extract_strided_slice %3 {offsets = [1, 0, 0], sizes = [1, 8, 16], strides = [1, 1, 1]} : vector<4x8x16xf32> to vector<1x8x16xf32>
    %116 = vector.shape_cast %115 : vector<1x8x16xf32> to vector<8x16xf32>
    %117 = vector.extract_strided_slice %4 {offsets = [1, 0, 0], sizes = [1, 8, 16], strides = [1, 1, 1]} : vector<4x8x16xf32> to vector<1x8x16xf32>
    %118 = vector.shape_cast %117 : vector<1x8x16xf32> to vector<8x16xf32>
    %cst_29 = arith.constant -3.000000e+38 : f32
    %119 = vector.shape_cast %106 : vector<1x16xi1> to vector<1x16xi1>
    %120 = vector.broadcast %119 : vector<1x16xi1> to vector<8x16xi1>
    %121 = vector.broadcast %cst_29 : f32 to vector<8x16xf32>
    %122 = arith.select %120, %116, %121 : vector<8x16xi1>, vector<8x16xf32>
    %cst_30 = arith.constant dense<0xFF800000> : vector<8xf32>
    %123 = vector.multi_reduction <maximumf>, %122, %cst_30 [1] : vector<8x16xf32> to vector<8xf32>
    %124 = vector.shape_cast %123 : vector<8xf32> to vector<8x1xf32>
    %cst_31 = arith.constant 0.000000e+00 : f32
    %125 = vector.broadcast %cst_31 : f32 to vector<8x1xf32>
    %126 = arith.select %102, %124, %125 : vector<8x1xi1>, vector<8x1xf32>
    %cst_32 = arith.constant dense<0.000000e+00> : vector<1xf32>
    %127 = vector.multi_reduction <add>, %126, %cst_32 [0] : vector<8x1xf32> to vector<1xf32>
    %128 = vector.shape_cast %127 : vector<1xf32> to vector<1x1xf32>
    %129 = vector.broadcast %113 : f32 to vector<1x1xf32>
    %130 = arith.divf %128, %129 : vector<1x1xf32>
    %cst_33 = arith.constant -3.000000e+38 : f32
    %131 = vector.shape_cast %112 : vector<1x16xi1> to vector<1x16xi1>
    %132 = vector.broadcast %131 : vector<1x16xi1> to vector<8x16xi1>
    %133 = vector.broadcast %cst_33 : f32 to vector<8x16xf32>
    %134 = arith.select %132, %116, %133 : vector<8x16xi1>, vector<8x16xf32>
    %cst_34 = arith.constant dense<0xFF800000> : vector<8xf32>
    %135 = vector.multi_reduction <maximumf>, %134, %cst_34 [1] : vector<8x16xf32> to vector<8xf32>
    %136 = vector.shape_cast %135 : vector<8xf32> to vector<8x1xf32>
    %cst_35 = arith.constant 0.000000e+00 : f32
    %137 = vector.broadcast %cst_35 : f32 to vector<8x1xf32>
    %138 = arith.select %102, %136, %137 : vector<8x1xi1>, vector<8x1xf32>
    %cst_36 = arith.constant dense<0.000000e+00> : vector<1xf32>
    %139 = vector.multi_reduction <add>, %138, %cst_36 [0] : vector<8x1xf32> to vector<1xf32>
    %140 = vector.shape_cast %139 : vector<1xf32> to vector<1x1xf32>
    %141 = vector.broadcast %113 : f32 to vector<1x1xf32>
    %142 = arith.divf %140, %141 : vector<1x1xf32>
    %cst_37 = arith.constant -3.000000e+38 : f32
    %143 = vector.shape_cast %106 : vector<1x16xi1> to vector<1x16xi1>
    %144 = vector.broadcast %143 : vector<1x16xi1> to vector<8x16xi1>
    %145 = vector.broadcast %cst_37 : f32 to vector<8x16xf32>
    %146 = arith.select %144, %118, %145 : vector<8x16xi1>, vector<8x16xf32>
    %cst_38 = arith.constant dense<0xFF800000> : vector<8xf32>
    %147 = vector.multi_reduction <maximumf>, %146, %cst_38 [1] : vector<8x16xf32> to vector<8xf32>
    %148 = vector.shape_cast %147 : vector<8xf32> to vector<8x1xf32>
    %cst_39 = arith.constant 0.000000e+00 : f32
    %149 = vector.broadcast %cst_39 : f32 to vector<8x1xf32>
    %150 = arith.select %104, %148, %149 : vector<8x1xi1>, vector<8x1xf32>
    %cst_40 = arith.constant dense<0.000000e+00> : vector<1xf32>
    %151 = vector.multi_reduction <add>, %150, %cst_40 [0] : vector<8x1xf32> to vector<1xf32>
    %152 = vector.shape_cast %151 : vector<1xf32> to vector<1x1xf32>
    %153 = vector.broadcast %114 : f32 to vector<1x1xf32>
    %154 = arith.divf %152, %153 : vector<1x1xf32>
    %cst_41 = arith.constant 1.000000e+00 : f32
    %155 = vector.broadcast %cst_41 : f32 to vector<1x1xf32>
    %156 = arith.addf %155, %142 : vector<1x1xf32>
    %157 = arith.subf %156, %130 : vector<1x1xf32>
    %cst_42 = arith.constant 1.000000e+00 : f32
    %158 = vector.broadcast %cst_42 : f32 to vector<1x1xf32>
    %159 = arith.addf %158, %154 : vector<1x1xf32>
    %160 = arith.subf %159, %130 : vector<1x1xf32>
    %cst_43 = arith.constant 0.000000e+00 : f32
    %161 = vector.broadcast %cst_43 : f32 to vector<1x1xf32>
    %162 = arith.maximumf %157, %161 : vector<1x1xf32>
    %cst_44 = arith.constant 0.000000e+00 : f32
    %163 = vector.broadcast %cst_44 : f32 to vector<1x1xf32>
    %164 = arith.maximumf %160, %163 : vector<1x1xf32>
    %165 = arith.addf %162, %164 : vector<1x1xf32>
    %166 = vector.broadcast %100 : f32 to vector<1x1xf32>
    %167 = arith.mulf %165, %166 : vector<1x1xf32>
    %168 = arith.addf %88, %167 : vector<1x1xf32>
    %c2_i32 = arith.constant 2 : i32
    %169 = arith.addi %7, %c2_i32 : i32
    %170 = arith.index_cast %169 : i32 to index
    %171 = memref.load %arg1[%170] : memref<4xi32, #tpu.memory_space<smem>>
    %172 = arith.index_cast %169 : i32 to index
    %173 = memref.load %arg2[%172] : memref<4xi32, #tpu.memory_space<smem>>
    %174 = arith.index_cast %169 : i32 to index
    %175 = memref.load %arg3[%174] : memref<4xi32, #tpu.memory_space<smem>>
    %176 = arith.index_cast %169 : i32 to index
    %177 = memref.load %arg4[%176] : memref<4xi32, #tpu.memory_space<smem>>
    %178 = arith.index_cast %169 : i32 to index
    %179 = memref.load %arg5[%178] : memref<4xi32, #tpu.memory_space<smem>>
    %180 = arith.sitofp %179 : i32 to f32
    %181 = vector.broadcast %171 : i32 to vector<8x1xi32>
    %182 = arith.cmpi slt, %5, %181 : vector<8x1xi32>
    %183 = vector.broadcast %173 : i32 to vector<8x1xi32>
    %184 = arith.cmpi slt, %5, %183 : vector<8x1xi32>
    %185 = vector.broadcast %175 : i32 to vector<1x16xi32>
    %186 = arith.cmpi slt, %6, %185 : vector<1x16xi32>
    %c8_i32_45 = arith.constant 8 : i32
    %187 = vector.broadcast %c8_i32_45 : i32 to vector<1x16xi32>
    %188 = arith.cmpi sge, %6, %187 : vector<1x16xi32>
    %c8_i32_46 = arith.constant 8 : i32
    %189 = arith.addi %c8_i32_46, %177 : i32
    %190 = vector.broadcast %189 : i32 to vector<1x16xi32>
    %191 = arith.cmpi slt, %6, %190 : vector<1x16xi32>
    %192 = arith.andi %188, %191 : vector<1x16xi1>
    %193 = arith.sitofp %171 : i32 to f32
    %194 = arith.sitofp %173 : i32 to f32
    %195 = vector.extract_strided_slice %3 {offsets = [2, 0, 0], sizes = [1, 8, 16], strides = [1, 1, 1]} : vector<4x8x16xf32> to vector<1x8x16xf32>
    %196 = vector.shape_cast %195 : vector<1x8x16xf32> to vector<8x16xf32>
    %197 = vector.extract_strided_slice %4 {offsets = [2, 0, 0], sizes = [1, 8, 16], strides = [1, 1, 1]} : vector<4x8x16xf32> to vector<1x8x16xf32>
    %198 = vector.shape_cast %197 : vector<1x8x16xf32> to vector<8x16xf32>
    %cst_47 = arith.constant -3.000000e+38 : f32
    %199 = vector.shape_cast %186 : vector<1x16xi1> to vector<1x16xi1>
    %200 = vector.broadcast %199 : vector<1x16xi1> to vector<8x16xi1>
    %201 = vector.broadcast %cst_47 : f32 to vector<8x16xf32>
    %202 = arith.select %200, %196, %201 : vector<8x16xi1>, vector<8x16xf32>
    %cst_48 = arith.constant dense<0xFF800000> : vector<8xf32>
    %203 = vector.multi_reduction <maximumf>, %202, %cst_48 [1] : vector<8x16xf32> to vector<8xf32>
    %204 = vector.shape_cast %203 : vector<8xf32> to vector<8x1xf32>
    %cst_49 = arith.constant 0.000000e+00 : f32
    %205 = vector.broadcast %cst_49 : f32 to vector<8x1xf32>
    %206 = arith.select %182, %204, %205 : vector<8x1xi1>, vector<8x1xf32>
    %cst_50 = arith.constant dense<0.000000e+00> : vector<1xf32>
    %207 = vector.multi_reduction <add>, %206, %cst_50 [0] : vector<8x1xf32> to vector<1xf32>
    %208 = vector.shape_cast %207 : vector<1xf32> to vector<1x1xf32>
    %209 = vector.broadcast %193 : f32 to vector<1x1xf32>
    %210 = arith.divf %208, %209 : vector<1x1xf32>
    %cst_51 = arith.constant -3.000000e+38 : f32
    %211 = vector.shape_cast %192 : vector<1x16xi1> to vector<1x16xi1>
    %212 = vector.broadcast %211 : vector<1x16xi1> to vector<8x16xi1>
    %213 = vector.broadcast %cst_51 : f32 to vector<8x16xf32>
    %214 = arith.select %212, %196, %213 : vector<8x16xi1>, vector<8x16xf32>
    %cst_52 = arith.constant dense<0xFF800000> : vector<8xf32>
    %215 = vector.multi_reduction <maximumf>, %214, %cst_52 [1] : vector<8x16xf32> to vector<8xf32>
    %216 = vector.shape_cast %215 : vector<8xf32> to vector<8x1xf32>
    %cst_53 = arith.constant 0.000000e+00 : f32
    %217 = vector.broadcast %cst_53 : f32 to vector<8x1xf32>
    %218 = arith.select %182, %216, %217 : vector<8x1xi1>, vector<8x1xf32>
    %cst_54 = arith.constant dense<0.000000e+00> : vector<1xf32>
    %219 = vector.multi_reduction <add>, %218, %cst_54 [0] : vector<8x1xf32> to vector<1xf32>
    %220 = vector.shape_cast %219 : vector<1xf32> to vector<1x1xf32>
    %221 = vector.broadcast %193 : f32 to vector<1x1xf32>
    %222 = arith.divf %220, %221 : vector<1x1xf32>
    %cst_55 = arith.constant -3.000000e+38 : f32
    %223 = vector.shape_cast %186 : vector<1x16xi1> to vector<1x16xi1>
    %224 = vector.broadcast %223 : vector<1x16xi1> to vector<8x16xi1>
    %225 = vector.broadcast %cst_55 : f32 to vector<8x16xf32>
    %226 = arith.select %224, %198, %225 : vector<8x16xi1>, vector<8x16xf32>
    %cst_56 = arith.constant dense<0xFF800000> : vector<8xf32>
    %227 = vector.multi_reduction <maximumf>, %226, %cst_56 [1] : vector<8x16xf32> to vector<8xf32>
    %228 = vector.shape_cast %227 : vector<8xf32> to vector<8x1xf32>
    %cst_57 = arith.constant 0.000000e+00 : f32
    %229 = vector.broadcast %cst_57 : f32 to vector<8x1xf32>
    %230 = arith.select %184, %228, %229 : vector<8x1xi1>, vector<8x1xf32>
    %cst_58 = arith.constant dense<0.000000e+00> : vector<1xf32>
    %231 = vector.multi_reduction <add>, %230, %cst_58 [0] : vector<8x1xf32> to vector<1xf32>
    %232 = vector.shape_cast %231 : vector<1xf32> to vector<1x1xf32>
    %233 = vector.broadcast %194 : f32 to vector<1x1xf32>
    %234 = arith.divf %232, %233 : vector<1x1xf32>
    %cst_59 = arith.constant 1.000000e+00 : f32
    %235 = vector.broadcast %cst_59 : f32 to vector<1x1xf32>
    %236 = arith.addf %235, %222 : vector<1x1xf32>
    %237 = arith.subf %236, %210 : vector<1x1xf32>
    %cst_60 = arith.constant 1.000000e+00 : f32
    %238 = vector.broadcast %cst_60 : f32 to vector<1x1xf32>
    %239 = arith.addf %238, %234 : vector<1x1xf32>
    %240 = arith.subf %239, %210 : vector<1x1xf32>
    %cst_61 = arith.constant 0.000000e+00 : f32
    %241 = vector.broadcast %cst_61 : f32 to vector<1x1xf32>
    %242 = arith.maximumf %237, %241 : vector<1x1xf32>
    %cst_62 = arith.constant 0.000000e+00 : f32
    %243 = vector.broadcast %cst_62 : f32 to vector<1x1xf32>
    %244 = arith.maximumf %240, %243 : vector<1x1xf32>
    %245 = arith.addf %242, %244 : vector<1x1xf32>
    %246 = vector.broadcast %180 : f32 to vector<1x1xf32>
    %247 = arith.mulf %245, %246 : vector<1x1xf32>
    %248 = arith.addf %168, %247 : vector<1x1xf32>
    %c3_i32 = arith.constant 3 : i32
    %249 = arith.addi %7, %c3_i32 : i32
    %250 = arith.index_cast %249 : i32 to index
    %251 = memref.load %arg1[%250] : memref<4xi32, #tpu.memory_space<smem>>
    %252 = arith.index_cast %249 : i32 to index
    %253 = memref.load %arg2[%252] : memref<4xi32, #tpu.memory_space<smem>>
    %254 = arith.index_cast %249 : i32 to index
    %255 = memref.load %arg3[%254] : memref<4xi32, #tpu.memory_space<smem>>
    %256 = arith.index_cast %249 : i32 to index
    %257 = memref.load %arg4[%256] : memref<4xi32, #tpu.memory_space<smem>>
    %258 = arith.index_cast %249 : i32 to index
    %259 = memref.load %arg5[%258] : memref<4xi32, #tpu.memory_space<smem>>
    %260 = arith.sitofp %259 : i32 to f32
    %261 = vector.broadcast %251 : i32 to vector<8x1xi32>
    %262 = arith.cmpi slt, %5, %261 : vector<8x1xi32>
    %263 = vector.broadcast %253 : i32 to vector<8x1xi32>
    %264 = arith.cmpi slt, %5, %263 : vector<8x1xi32>
    %265 = vector.broadcast %255 : i32 to vector<1x16xi32>
    %266 = arith.cmpi slt, %6, %265 : vector<1x16xi32>
    %c8_i32_63 = arith.constant 8 : i32
    %267 = vector.broadcast %c8_i32_63 : i32 to vector<1x16xi32>
    %268 = arith.cmpi sge, %6, %267 : vector<1x16xi32>
    %c8_i32_64 = arith.constant 8 : i32
    %269 = arith.addi %c8_i32_64, %257 : i32
    %270 = vector.broadcast %269 : i32 to vector<1x16xi32>
    %271 = arith.cmpi slt, %6, %270 : vector<1x16xi32>
    %272 = arith.andi %268, %271 : vector<1x16xi1>
    %273 = arith.sitofp %251 : i32 to f32
    %274 = arith.sitofp %253 : i32 to f32
    %275 = vector.extract_strided_slice %3 {offsets = [3, 0, 0], sizes = [1, 8, 16], strides = [1, 1, 1]} : vector<4x8x16xf32> to vector<1x8x16xf32>
    %276 = vector.shape_cast %275 : vector<1x8x16xf32> to vector<8x16xf32>
    %277 = vector.extract_strided_slice %4 {offsets = [3, 0, 0], sizes = [1, 8, 16], strides = [1, 1, 1]} : vector<4x8x16xf32> to vector<1x8x16xf32>
    %278 = vector.shape_cast %277 : vector<1x8x16xf32> to vector<8x16xf32>
    %cst_65 = arith.constant -3.000000e+38 : f32
    %279 = vector.shape_cast %266 : vector<1x16xi1> to vector<1x16xi1>
    %280 = vector.broadcast %279 : vector<1x16xi1> to vector<8x16xi1>
    %281 = vector.broadcast %cst_65 : f32 to vector<8x16xf32>
    %282 = arith.select %280, %276, %281 : vector<8x16xi1>, vector<8x16xf32>
    %cst_66 = arith.constant dense<0xFF800000> : vector<8xf32>
    %283 = vector.multi_reduction <maximumf>, %282, %cst_66 [1] : vector<8x16xf32> to vector<8xf32>
    %284 = vector.shape_cast %283 : vector<8xf32> to vector<8x1xf32>
    %cst_67 = arith.constant 0.000000e+00 : f32
    %285 = vector.broadcast %cst_67 : f32 to vector<8x1xf32>
    %286 = arith.select %262, %284, %285 : vector<8x1xi1>, vector<8x1xf32>
    %cst_68 = arith.constant dense<0.000000e+00> : vector<1xf32>
    %287 = vector.multi_reduction <add>, %286, %cst_68 [0] : vector<8x1xf32> to vector<1xf32>
    %288 = vector.shape_cast %287 : vector<1xf32> to vector<1x1xf32>
    %289 = vector.broadcast %273 : f32 to vector<1x1xf32>
    %290 = arith.divf %288, %289 : vector<1x1xf32>
    %cst_69 = arith.constant -3.000000e+38 : f32
    %291 = vector.shape_cast %272 : vector<1x16xi1> to vector<1x16xi1>
    %292 = vector.broadcast %291 : vector<1x16xi1> to vector<8x16xi1>
    %293 = vector.broadcast %cst_69 : f32 to vector<8x16xf32>
    %294 = arith.select %292, %276, %293 : vector<8x16xi1>, vector<8x16xf32>
    %cst_70 = arith.constant dense<0xFF800000> : vector<8xf32>
    %295 = vector.multi_reduction <maximumf>, %294, %cst_70 [1] : vector<8x16xf32> to vector<8xf32>
    %296 = vector.shape_cast %295 : vector<8xf32> to vector<8x1xf32>
    %cst_71 = arith.constant 0.000000e+00 : f32
    %297 = vector.broadcast %cst_71 : f32 to vector<8x1xf32>
    %298 = arith.select %262, %296, %297 : vector<8x1xi1>, vector<8x1xf32>
    %cst_72 = arith.constant dense<0.000000e+00> : vector<1xf32>
    %299 = vector.multi_reduction <add>, %298, %cst_72 [0] : vector<8x1xf32> to vector<1xf32>
    %300 = vector.shape_cast %299 : vector<1xf32> to vector<1x1xf32>
    %301 = vector.broadcast %273 : f32 to vector<1x1xf32>
    %302 = arith.divf %300, %301 : vector<1x1xf32>
    %cst_73 = arith.constant -3.000000e+38 : f32
    %303 = vector.shape_cast %266 : vector<1x16xi1> to vector<1x16xi1>
    %304 = vector.broadcast %303 : vector<1x16xi1> to vector<8x16xi1>
    %305 = vector.broadcast %cst_73 : f32 to vector<8x16xf32>
    %306 = arith.select %304, %278, %305 : vector<8x16xi1>, vector<8x16xf32>
    %cst_74 = arith.constant dense<0xFF800000> : vector<8xf32>
    %307 = vector.multi_reduction <maximumf>, %306, %cst_74 [1] : vector<8x16xf32> to vector<8xf32>
    %308 = vector.shape_cast %307 : vector<8xf32> to vector<8x1xf32>
    %cst_75 = arith.constant 0.000000e+00 : f32
    %309 = vector.broadcast %cst_75 : f32 to vector<8x1xf32>
    %310 = arith.select %264, %308, %309 : vector<8x1xi1>, vector<8x1xf32>
    %cst_76 = arith.constant dense<0.000000e+00> : vector<1xf32>
    %311 = vector.multi_reduction <add>, %310, %cst_76 [0] : vector<8x1xf32> to vector<1xf32>
    %312 = vector.shape_cast %311 : vector<1xf32> to vector<1x1xf32>
    %313 = vector.broadcast %274 : f32 to vector<1x1xf32>
    %314 = arith.divf %312, %313 : vector<1x1xf32>
    %cst_77 = arith.constant 1.000000e+00 : f32
    %315 = vector.broadcast %cst_77 : f32 to vector<1x1xf32>
    %316 = arith.addf %315, %302 : vector<1x1xf32>
    %317 = arith.subf %316, %290 : vector<1x1xf32>
    %cst_78 = arith.constant 1.000000e+00 : f32
    %318 = vector.broadcast %cst_78 : f32 to vector<1x1xf32>
    %319 = arith.addf %318, %314 : vector<1x1xf32>
    %320 = arith.subf %319, %290 : vector<1x1xf32>
    %cst_79 = arith.constant 0.000000e+00 : f32
    %321 = vector.broadcast %cst_79 : f32 to vector<1x1xf32>
    %322 = arith.maximumf %317, %321 : vector<1x1xf32>
    %cst_80 = arith.constant 0.000000e+00 : f32
    %323 = vector.broadcast %cst_80 : f32 to vector<1x1xf32>
    %324 = arith.maximumf %320, %323 : vector<1x1xf32>
    %325 = arith.addf %322, %324 : vector<1x1xf32>
    %326 = vector.broadcast %260 : f32 to vector<1x1xf32>
    %327 = arith.mulf %325, %326 : vector<1x1xf32>
    %328 = arith.addf %248, %327 : vector<1x1xf32>
    %329 = vector.shape_cast %328 : vector<1x1xf32> to vector<1x1x1xf32>
    %c0_81 = arith.constant 0 : index
    %c0_82 = arith.constant 0 : index
    %c0_83 = arith.constant 0 : index
    %330 = vector.load %arg9[%c0_81, %c0_82, %c0_83] : memref<1x1x1xf32, #tpu.memory_space<vmem>>, vector<1x1x1xf32>
    tpu.vector_store %arg9[%c0_81, %c0_82, %c0_83], %329 {strides = array<i32>} : memref<1x1x1xf32, #tpu.memory_space<vmem>>, vector<1x1x1xf32>,
    return
  }
  func.func @transform_0(%arg0: i32, %arg1: memref<4xi32, #tpu.memory_space<smem>>, %arg2: memref<4xi32, #tpu.memory_space<smem>>, %arg3: memref<4xi32, #tpu.memory_space<smem>>, %arg4: memref<4xi32, #tpu.memory_space<smem>>, %arg5: memref<4xi32, #tpu.memory_space<smem>>) -> (i32, i32, i32) {
    %c0_i32 = arith.constant 0 : i32
    %c0_i32_0 = arith.constant 0 : i32
    %c0_i32_1 = arith.constant 0 : i32
    return %arg0, %c0_i32, %c0_i32_0 : i32, i32, i32
  }
  func.func @transform_1(%arg0: i32, %arg1: memref<4xi32, #tpu.memory_space<smem>>, %arg2: memref<4xi32, #tpu.memory_space<smem>>, %arg3: memref<4xi32, #tpu.memory_space<smem>>, %arg4: memref<4xi32, #tpu.memory_space<smem>>, %arg5: memref<4xi32, #tpu.memory_space<smem>>) -> (i32, i32, i32) {
    %c0_i32 = arith.constant 0 : i32
    %c0_i32_0 = arith.constant 0 : i32
    %c0_i32_1 = arith.constant 0 : i32
    return %arg0, %c0_i32, %c0_i32_0 : i32, i32, i32
  }
  func.func @transform_2(%arg0: i32, %arg1: memref<4xi32, #tpu.memory_space<smem>>, %arg2: memref<4xi32, #tpu.memory_space<smem>>, %arg3: memref<4xi32, #tpu.memory_space<smem>>, %arg4: memref<4xi32, #tpu.memory_space<smem>>, %arg5: memref<4xi32, #tpu.memory_space<smem>>) -> (i32, i32, i32) {
    %c0_i32 = arith.constant 0 : i32
    %c0_i32_0 = arith.constant 0 : i32
    %c0_i32_1 = arith.constant 0 : i32
    return %arg0, %c0_i32, %c0_i32_0 : i32, i32, i32
  }
  func.func @transform_3(%arg0: i32, %arg1: memref<4xi32, #tpu.memory_space<smem>>, %arg2: memref<4xi32, #tpu.memory_space<smem>>, %arg3: memref<4xi32, #tpu.memory_space<smem>>, %arg4: memref<4xi32, #tpu.memory_space<smem>>, %arg5: memref<4xi32, #tpu.memory_space<smem>>) -> (i32, i32, i32) {
    %c0_i32 = arith.constant 0 : i32
    %c0_i32_0 = arith.constant 0 : i32
    %c0_i32_1 = arith.constant 0 : i32
    return %arg0, %c0_i32, %c0_i32_0 : i32, i32, i32
  }
}

</mosaic_0001>

<bundles_post_ra>
// kernel: tpu_custom_call.1
= control target key start
LH: loop header
LB: loop body
LE: loop exit
PB: predicated region body
PF: predicated region fallthrough
CT: control target
= control target key end

     0   :  { %s843_s11 = smov [#allocation3]   ;;  %s844_s12 = smov [#allocation4]   ;;  %s1364_s0 = inlined_call_operand.vmem [shape: s32[4], index: 0, kind: input, shape index: {}]   ;;  %s1365_s5 = inlined_call_operand.vmem [shape: bf16[4,8,32], index: 5, kind: input, shape index: {}]   ;;  %s1366_s6 = inlined_call_operand.vmem [shape: bf16[4,8,32], index: 6, kind: input, shape index: {}]   ;;  %s1367_s7 = inlined_call_operand.vmem [shape: bf16[4,32,16], index: 7, kind: input, shape index: {}]   ;;  %s1368_s8 = inlined_call_operand.hbm [shape: f32[1,1,1], index: 8, kind: output, shape index: {}]   ;;  %s1369_s1 = inlined_call_operand.vmem [shape: s32[4], index: 1, kind: input, shape index: {}]   ;;  %s1370_s2 = inlined_call_operand.vmem [shape: s32[4], index: 2, kind: input, shape index: {}]   ;;  %s1371_s3 = inlined_call_operand.vmem [shape: s32[4], index: 3, kind: input, shape index: {}]   ;;  %s1372_s4 = inlined_call_operand.vmem [shape: s32[4], index: 4, kind: input, shape index: {}]  }
   0x1   :  { %s14_s29 = sshll.u32 %s1364_s0, 4  ;;  %s19_s10 = sshll.u32 %s1369_s1, 4  ;;  %s15_s29 = int_to_ptr.vmem [resolvable:$true] %s14_s29  ;;  %s20_s10 = int_to_ptr.vmem [resolvable:$true] %s19_s10 }
   0x2   :  { %17 = dma.vmem_to_smem %s15_s29, 16, %s843_s11, [#allocation2] }
   0x3   :  { %22 = dma.vmem_to_smem %s20_s10, 16, %s844_s12, [#allocation2] }
   0x4   :  { %s24_s15 = sshll.u32 %s1370_s2, 4  ;;  %s29_s18 = sshll.u32 %s1371_s3, 4  ;;  %s25_s15 = int_to_ptr.vmem [resolvable:$true] %s24_s15  ;;  %s30_s18 = int_to_ptr.vmem [resolvable:$true] %s29_s18 }
   0x5   :  { %s845_s0 = smov [#allocation5]   ;;  %s846_s19 = smov [#allocation6]  }
   0x6   :  { %27 = dma.vmem_to_smem %s25_s15, 16, %s845_s0, [#allocation2] }
   0x7   :  { %32 = dma.vmem_to_smem %s30_s18, 16, %s846_s19, [#allocation2] }
   0x8   :  { %s34_s21 = sshll.u32 %s1372_s4, 4  ;;  %s847_s22 = smov [#allocation7]   ;;  %s35_s21 = int_to_ptr.vmem [resolvable:$true] %s34_s21 }
   0x9   :  { %37 = dma.vmem_to_smem %s35_s21, 16, %s847_s22, [#allocation2] }
   0xa   :  { %839 = dma.done.wait [#allocation2], 80 }
   0xb   :  { %840 = vsyncadd [#allocation2], 4294967216 }
   0xc   :  { %40 = sfence }
   0xd   :  { %v726_v0 = vld [vmem:[%s1367_s7 + $0x8] sm:$0xff]  ;;  %v728_v1 = vld [vmem:[%s1367_s7 + $0x18] sm:$0xff]  ;;  %v725_v4 = vld [vmem:[%s1367_s7] sm:$0xff] }
   0xe   :  { %v730_v2 = vld [vmem:[%s1367_s7 + $0x28] sm:$0xff]  ;;  %v732_v3 = vld [vmem:[%s1367_s7 + $0x38] sm:$0xff]  ;;  %95 = vmatpush.bf16.msra.mxu0 %v726_v0  ;;  %123 = vmatpush.bf16.msra.mxu1 %v728_v1  ;;  %v727_v5 = vld [vmem:[%s1367_s7 + $0x10] sm:$0xff] }
   0xf   :  { %151 = vmatpush.bf16.msra.mxu2 %v730_v2  ;;  %179 = vmatpush.bf16.msra.mxu3 %v732_v3  ;;  %v729_v6 = vld [vmem:[%s1367_s7 + $0x20] sm:$0xff]  ;;  %v731_v7 = vld [vmem:[%s1367_s7 + $0x30] sm:$0xff] }
  0x10   :  { %41 = vsyncpa [#allocation9], 0  ;;  %v49_v8 = vld [vmem:[%s1365_s5] sm:$0xf]  ;;  %vm85_vm0 = vcmask 261120   ;;  %s713_s24 = sld [smem:[#allocation6 + $0x1]]  ;;  %v250_v16 = vlaneseq }
  0x11   :  { %v50_v9 = vld [vmem:[%s1365_s5 + $0x4] sm:$0xf]  ;;  %v51_v10 = vld [vmem:[%s1365_s5 + $0x8] sm:$0xf]  ;;  %v52_v11 = vld [vmem:[%s1365_s5 + $0xc] sm:$0xf] }
  0x12   :  { %96 = vmatpush.bf16.msra.mxu0 %v725_v4  ;;  %124 = vmatpush.bf16.msra.mxu1 %v727_v5  ;;  %v53_v12 = vld [vmem:[%s1366_s6] sm:$0xf]  ;;  %v54_v13 = vld [vmem:[%s1366_s6 + $0x4] sm:$0xf]  ;;  %v55_v14 = vld [vmem:[%s1366_s6 + $0x8] sm:$0xf] }
  0x13   :  { %152 = vmatpush.bf16.msra.mxu2 %v729_v6  ;;  %180 = vmatpush.bf16.msra.mxu3 %v731_v7  ;;  %v56_v15 = vld [vmem:[%s1366_s6 + $0xc] sm:$0xf]  ;;  %s258_s25 = sld [smem:[#allocation6]]  ;;  %v253_v17 = vand.u32 127, %v250_v16  ;;  %vm277_vm7 = vcmask 130048  }
  0x14   :  { %s257_s26 = sld [smem:[#allocation5]] }
  0x15   :  { %678 = vmatmul.msk.bf16.vlgmr.msra.gmra.mxu0 %vm85_vm0, %v49_v8  ;;  %687 = vmatmul.msk.bf16.vlgmr.msra.gmra.mxu1 %vm85_vm0, %v50_v9  ;;  %s718_s4 = sld [smem:[#allocation6 + $0x2]]  ;;  %vm267_vm1 = vcmp.ge.s32.totalorder %v253_v17, 8 }
  0x16   :  { %211 = vmatpush.bf16.msrb.mxu1 %v728_v1  ;;  %696 = vmatmul.msk.bf16.vlgmr.msra.gmra.mxu2 %vm85_vm0, %v51_v10  ;;  %s368_s27 = sadd.s32 8, %s713_s24  ;;  %s712_s6 = sld [smem:[#allocation5 + $0x1]] }
  0x17   :  { %227 = vmatpush.bf16.msrb.mxu2 %v730_v2  ;;  %705 = vmatmul.msk.bf16.vlgmr.msra.gmra.mxu3 %vm85_vm0, %v52_v11  ;;  %v369_v18 = vstv %s368_s27  ;;  %s717_s30 = sld [smem:[#allocation5 + $0x2]] }
  0x18   :  { %195 = vmatpush.bf16.msrb.mxu0 %v726_v0  ;;  %243 = vmatpush.bf16.msrb.mxu3 %v732_v3  ;;  %vm370_vm2 = vcmp.lt.s32.totalorder %v253_v17, %v369_v18  ;;  %s723_s9 = sld [smem:[#allocation6 + $0x3]] }
  0x19   :  { %s268_s28 = sadd.s32 8, %s258_s25  ;;  %vm371_vm4 = vmand %vm267_vm1, %vm370_vm2  ;;  %s722_s10 = sld [smem:[#allocation5 + $0x3]] }
  0x1a   :  { %212 = vmatpush.bf16.msrb.mxu1 %v727_v5  ;;  %v269_v19 = vstv %s268_s28  ;;  %v265_v20 = vstv %s257_s26  ;;  %s1014_s12 = sld [smem:[#allocation3 + $0x1]] }
  0x1b   :  { %228 = vmatpush.bf16.msrb.mxu2 %v729_v6  ;;  %vm270_vm3 = vcmp.lt.s32.totalorder %v253_v17, %v269_v19  ;;  %s467_s29 = sadd.s32 8, %s718_s4  ;;  %vm968_vm6 = vcmp.lt.s32.totalorder %v253_v17, %v265_v20  ;;  %s1016_s13 = sld [smem:[#allocation3]] }
  0x1c   :  { %196 = vmatpush.bf16.msrb.mxu0 %v725_v4  ;;  %244 = vmatpush.bf16.msrb.mxu3 %v731_v7  ;;  %vm271_vm5 = vmand %vm267_vm1, %vm270_vm3  ;;  %v468_v22 = vstv %s467_s29  ;;  %v366_v28 = vstv %s712_s6  ;;  %s1020_s16 = sld [smem:[#allocation3 + $0x2]]  ;;  %s848_s6 = smov [#allocation8]  }
  0x1d   :  { %vm469_vm8 = vcmp.lt.s32.totalorder %v253_v17, %v468_v22  ;;  %vm978_vm10 = vcmp.lt.s32.totalorder %v253_v17, %v366_v28  ;;  %v465_v40 = vstv %s717_s30  ;;  %s1022_s17 = sld [smem:[#allocation4 + $0x1]]  ;;  %s659_s29 = sshll.u32 %s848_s6, 4  ;;  %s660_s29 = int_to_ptr.vmem [resolvable:$true] %s659_s29 }
  0x1e   :  { %vm470_vm9 = vmand %vm267_vm1, %vm469_vm8  ;;  %s566_s11 = sadd.s32 8, %s723_s9  ;;  %vm986_vm11 = vcmp.lt.s32.totalorder %v253_v17, %v465_v40  ;;  %s1025_s0 = sld [smem:[#allocation4]] }
  0x1f   :  { %v567_v43 = vstv %s566_s11  ;;  %v564_v53 = vstv %s722_s10  ;;  %s1034_s7 = sld [smem:[#allocation4 + $0x2]]  ;;  %s661_s10 = sshll.u32 %s1368_s8, 4  ;;  %s662_s10 = int_to_ptr.hbm [resolvable:$true] %s661_s10 }
  0x20   :  { %vm568_vm12 = vcmp.lt.s32.totalorder %v253_v17, %v567_v43  ;;  %vm1000_vm14 = vcmp.lt.s32.totalorder %v253_v17, %v564_v53  ;;  %s372_s14 = scvt.s32.f32 %s1014_s12  ;;  %s1037_s20 = sld [smem:[#allocation3 + $0x3]] }
  0x21   :  { %vm569_vm13 = vmand %vm267_vm1, %vm568_vm12  ;;  %s272_s15 = scvt.s32.f32 %s1016_s13  ;;  %v261_v43 = vstv %s1016_s13  ;;  %s1091_s22 = sld [smem:[#allocation4 + $0x3]] }
  0x22   :  { %v387_v6 = vstv %s372_s14  ;;  %s471_s18 = scvt.s32.f32 %s1020_s16  ;;  %s1322_s23 = sld [smem:[#allocation7]] }
  0x23   :  { %v288_v7 = vstv %s272_s15  ;;  %739 = vrcp.f32 %v387_v6  ;;  %s373_s19 = scvt.s32.f32 %s1022_s17  ;;  %vm393_vm15 = vweird.f32 %v387_v6  ;;  %s1328_s3 = sld [smem:[#allocation7 + $0x1]] }
  0x24   :  { %741 = vrcp.f32 %v288_v7  ;;  %v1029_v10 = vstv %s471_s18  ;;  %s273_s1 = scvt.s32.f32 %s1025_s0  ;;  %vm294_vm1 = vweird.f32 %v288_v7  ;;  %v300_v28 = vand.u32 2147483648, %v288_v7  ;;  %s1344_s24 = sld [smem:[#allocation7 + $0x2]] }
  0x25   :  { %706 = vmatmul.msk.bf16.vlgmr.msrb.gmra.mxu0 %vm85_vm0, %v53_v12  ;;  %707 = vmatmul.msk.bf16.vlgmr.msrb.gmra.mxu1 %vm85_vm0, %v54_v13  ;;  %743 = vrcp.f32 %v1029_v10  ;;  %s472_s5 = scvt.s32.f32 %s1034_s7  ;;  %s1352_s25 = sld [smem:[#allocation7 + $0x3]] }
  0x26   :  { %708 = vmatmul.msk.bf16.vlgmr.msrb.gmra.mxu2 %vm85_vm0, %v55_v14  ;;  %v1042_v17 = vstv %s273_s1  ;;  %s570_s21 = scvt.s32.f32 %s1037_s20  ;;  %v301_v42 = vor.u32 1.1754944e-38, %v300_v28 }
  0x27   :  { %709 = vmatmul.msk.bf16.vlgmr.msrb.gmra.mxu3 %vm85_vm0, %v56_v15  ;;  %v1039_v15 = vstv %s373_s19  ;;  %s571_s2 = scvt.s32.f32 %s1091_s22  ;;  %v339_v28 = vand.u32 2147483647, %v1042_v17 }
  0x28   :  { %745 = vrcp.f32 %v1039_v15  ;;  %vm434_vm12 = vweird.f32 %v1039_v15  ;;  %s260_s26 = scvt.s32.f32 %s1322_s23 }
  0x29   :  { %v740_v8 = vpop.eup %739  ;;  %747 = vrcp.f32 %v1042_v17  ;;  %s361_s27 = scvt.s32.f32 %s1328_s3 }
  0x2a   :  { %v1027_v9 = vpop.eup %741  ;;  %v389_v11 = vmul.f32 %v740_v8, %v387_v6  ;;  %vm394_vm0 = vweird.f32 %v740_v8  ;;  %s460_s4 = scvt.s32.f32 %s1344_s24 }
  0x2b   :  { %v290_v12 = vmul.f32 %v1027_v9, %v288_v7  ;;  %v1044_v18 = vpop.eup %743  ;;  %vm295_vm2 = vweird.f32 %v1027_v9  ;;  %vm1060_vm3 = vmor %vm393_vm15, %vm394_vm0  ;;  %s559_s28 = scvt.s32.f32 %s1352_s25 }
  0x2c   :  { %v390_v13 = vsub.f32 1.0, %v389_v11  ;;  %v488_v21 = vmul.f32 %v1044_v18, %v1029_v10 }
  0x2d   :  { %v291_v14 = vsub.f32 1.0, %v290_v12 }
  0x2e   :  { %v391_v19 = vmul.f32 %v740_v8, %v390_v13  ;;  %v1052_v22 = vpop.eup %745  ;;  %v489_v32 = vsub.f32 1.0, %v488_v21 }
  0x2f   :  { %v292_v20 = vmul.f32 %v1027_v9, %v291_v14  ;;  %v438_v14 = vand.u32 2147483647, %v1039_v15 }
  0x92   :  { %v98_v23 = vpop.f32.mrf.mxu0  ;;  %v126_v24 = vpop.f32.mrf.mxu1 }
  0x93   :  { %v405_v25 = vsel %vm371_vm4, %v126_v24, -3e+38  ;;  %v306_v26 = vsel %vm271_vm5, %v98_v23, -3e+38  ;;  %v276_v27 = vsel %vm968_vm6, %v98_v23, -3e+38  ;;  %vm1067_vm4 = vmor %vm294_vm1, %vm295_vm2 }
  0x94   :  { %v406_v29 = vsel %vm277_vm7, %v405_v25, -inf  ;;  %v307_v30 = vsel %vm277_vm7, %v306_v26, -inf  ;;  %v278_v31 = vsel %vm277_vm7, %v276_v27, -inf  ;;  %v376_v38 = vsel %vm978_vm10, %v126_v24, -3e+38  ;;  %v1055_v25 = vpop.eup %747 }
  0x95   :  { %407 = vmax.xlane.f32.xlu1 %v406_v29  ;;  %308 = vmax.xlane.f32.xlu0 %v307_v30  ;;  %v377_v41 = vsel %vm277_vm7, %v376_v38, -inf  ;;  %v397_v23 = vand.u32 2147483647, %v387_v6  ;;  %v399_v24 = vand.u32 2147483648, %v387_v6  ;;  %v392_v26 = vadd.f32 %v740_v8, %v391_v19 }
  0x96   :  { %279 = vmax.xlane.f32.xlu2 %v278_v31  ;;  %v293_v27 = vadd.f32 %v1027_v9, %v292_v20  ;;  %v1058_v29 = vstv %s472_s5  ;;  %v298_v31 = vand.u32 2147483647, %v288_v7  ;;  %vm336_vm15 = vweird.f32 %v1055_v25 }
  0x97   :  { %749 = vrcp.f32 %v1058_v29  ;;  %vm1077_vm5 = vcmp.eq.f32.partialorder %v397_v23, 8.507059e+37  ;;  %v396_v40 = vsel %vm1060_vm3, %v740_v8, %v392_v26  ;;  %v463_v30 = vstv %s1034_s7 }
  0x99   :  { %v154_v33 = vpop.f32.mrf.mxu2 }
  0x9a   :  { %v182_v34 = vpop.f32.mrf.mxu3  ;;  %v100_v35 = vpop.f32.mrf.mxu0  ;;  %v504_v37 = vsel %vm470_vm9, %v154_v33, -3e+38  ;;  %v475_v48 = vsel %vm986_vm11, %v154_v33, -3e+38  ;;  %v1065_v33 = vstv %s570_s21 }
  0x9b   :  { %v128_v36 = vpop.f32.mrf.mxu1  ;;  %v505_v39 = vsel %vm277_vm7, %v504_v37, -inf  ;;  %v476_v54 = vsel %vm277_vm7, %v475_v48, -inf  ;;  %v603_v58 = vsel %vm569_vm13, %v182_v34, -3e+38  ;;  %v574_v62 = vsel %vm1000_vm14, %v182_v34, -3e+38 }
  0x9c   :  { %v604_v0 = vsel %vm277_vm7, %v603_v58, -inf  ;;  %v575_v1 = vsel %vm277_vm7, %v574_v62, -inf  ;;  %v430_v35 = vmul.f32 %v1052_v22, %v1039_v15  ;;  %v1074_v36 = vshrl.u32 %v250_v16, 7 }
  0x9d   :  { %506 = vmax.xlane.f32.xlu0 %v505_v39  ;;  %v362_v37 = vstv %s1014_s12  ;;  %v331_v39 = vmul.f32 %v1055_v25, %v1042_v17  ;;  %751 = vrcp.f32 %v1065_v33  ;;  %v297_v16 = vsel %vm1067_vm4, %v1027_v9, %v293_v27  ;;  %v1095_v48 = vpop.eup %749 }
  0x9e   :  { %378 = vmax.xlane.f32.xlu2 %v377_v41  ;;  %v400_v41 = vor.u32 1.1754944e-38, %v399_v24  ;;  %vm1107_vm8 = vcmp.lt.s32.totalorder %v1074_v36, %v261_v43  ;;  %v529_v62 = vmul.f32 %v1095_v48, %v1058_v29  ;;  %vm435_vm13 = vweird.f32 %v1052_v22 }
  0x9f   :  { %vm1162_vm1 = vmor %vm434_vm12, %vm435_vm13  ;;  %v341_v24 = vand.u32 2147483648, %v1042_v17  ;;  %vm1192_vm4 = vcmp.eq.f32.partialorder %v438_v14, 8.507059e+37  ;;  %v562_v9 = vstv %s1091_s22 }
  0xa0   :  { %v530_v19 = vsub.f32 1.0, %v529_v62 }
  0xa1   :  { %v156_v44 = vpop.f32.mrf.mxu2  ;;  %v342_v43 = vor.u32 1.1754944e-38, %v341_v24 }
  0xa2   :  { %v184_v45 = vpop.f32.mrf.mxu3  ;;  %v198_v46 = vpop.f32.mrf.mxu0  ;;  %v490_v44 = vmul.f32 %v1044_v18, %v489_v32  ;;  %v560_v32 = vstv %s1037_s20 }
  0xa3   :  { %v214_v47 = vpop.f32.mrf.mxu1  ;;  %v318_v49 = vsel %vm968_vm6, %v198_v46, -3e+38  ;;  %vm299_vm6 = vcmp.eq.f32.partialorder %v298_v31, 8.507059e+37  ;;  %v461_v45 = vstv %s1020_s16  ;;  %v498_v46 = vand.u32 2147483648, %v1029_v10  ;;  %v1125_v58 = vpop.eup %751 }
  0xa4   :  { %v417_v50 = vsel %vm978_vm10, %v214_v47, -3e+38  ;;  %v319_v52 = vsel %vm277_vm7, %v318_v49, -inf  ;;  %v431_v47 = vsub.f32 1.0, %v430_v35  ;;  %v1111_v53 = vsel %vm299_vm6, %v301_v42, %v297_v16 }
  0xa5   :  { %v418_v51 = vsel %vm277_vm7, %v417_v50, -inf  ;;  %320 = vmax.xlane.f32.xlu0 %v319_v52  ;;  %v332_v50 = vsub.f32 1.0, %v331_v39  ;;  %vm1115_vm9 = vcmp.lt.s32.totalorder %v1074_v36, %v461_v45  ;;  %vm492_vm10 = vweird.f32 %v1029_v10 }
  0xa6   :  { %419 = vmax.xlane.f32.xlu1 %v418_v51  ;;  %477 = vmax.xlane.f32.xlu2 %v476_v54  ;;  %v1104_v51 = vsel %vm1077_vm5, %v400_v41, %v396_v40  ;;  %v364_v54 = vstv %s1022_s17  ;;  %v587_v11 = vmul.f32 %v1125_v58, %v1065_v33  ;;  %v1187_v35 = vstv %s571_s2 }
  0xa7   :  { %v531_v39 = vmul.f32 %v1095_v48, %v530_v19  ;;  %vm1202_vm5 = vcmp.eq.f32.partialorder %v339_v28, 8.507059e+37  ;;  %vm533_vm6 = vweird.f32 %v1058_v29  ;;  %753 = vrcp.f32 %v1187_v35 }
  0xa8   :  { %v588_v34 = vsub.f32 1.0, %v587_v11 }
  0xa9   :  { %v230_v56 = vpop.f32.mrf.mxu2  ;;  %v532_v52 = vadd.f32 %v1095_v48, %v531_v39 }
  0xaa   :  { %v246_v57 = vpop.f32.mrf.mxu3  ;;  %v516_v59 = vsel %vm986_vm11, %v230_v56, -3e+38  ;;  %v200_v60 = vpop.f32.mrf.mxu0  ;;  %v1120_v56 = vadd.f32 %v1044_v18, %v490_v44  ;;  %vm493_vm11 = vweird.f32 %v1044_v18 }
  0xab   :  { %v216_v61 = vpop.f32.mrf.mxu1  ;;  %v517_v63 = vsel %vm277_vm7, %v516_v59, -inf  ;;  %v615_v2 = vsel %vm1000_vm14, %v246_v57, -3e+38  ;;  %v263_v57 = vstv %s1025_s0  ;;  %v496_v59 = vand.u32 2147483647, %v1029_v10  ;;  %vm1149_vm0 = vmor %vm492_vm10, %vm493_vm11 }
  0xac   :  { %v616_v5 = vsel %vm277_vm7, %v615_v2, -inf  ;;  %vm1098_vm7 = vcmp.lt.s32.totalorder %v1074_v36, %v362_v37  ;;  %v1128_v60 = vor.u32 1.1754944e-38, %v498_v46  ;;  %v432_v61 = vmul.f32 %v1052_v22, %v431_v47 }
  0xad   :  { %605 = vmax.xlane.f32.xlu0 %v604_v0  ;;  %v333_v2 = vmul.f32 %v1055_v25, %v332_v50  ;;  %vm335_vm14 = vweird.f32 %v1042_v17  ;;  %v495_v26 = vsel %vm1149_vm0, %v1044_v18, %v1120_v56  ;;  %vm1172_vm2 = vcmp.eq.f32.partialorder %v496_v59, 8.507059e+37 }
  0xae   :  { %518 = vmax.xlane.f32.xlu1 %v517_v63  ;;  %576 = vmax.xlane.f32.xlu2 %v575_v1  ;;  %v440_v1 = vand.u32 2147483648, %v1039_v15  ;;  %v433_v13 = vadd.f32 %v1052_v22, %v432_v61  ;;  %vm1180_vm3 = vmor %vm335_vm14, %vm336_vm15  ;;  %v537_v56 = vand.u32 2147483647, %v1058_v29  ;;  %vm591_vm10 = vweird.f32 %v1065_v33 }
  0xaf   :  { %v334_v23 = vadd.f32 %v1055_v25, %v333_v2  ;;  %vm592_vm11 = vweird.f32 %v1125_v58  ;;  %v1219_v49 = vsel %vm1172_vm2, %v1128_v60, %v495_v26  ;;  %vm1231_vm12 = vcmp.lt.s32.totalorder %v1074_v36, %v263_v57 }
  0xb0   :  { %v437_v18 = vsel %vm1162_vm1, %v1052_v22, %v433_v13  ;;  %v441_v38 = vor.u32 1.1754944e-38, %v440_v1  ;;  %v539_v60 = vand.u32 2147483648, %v1058_v29  ;;  %vm1251_vm14 = vcmp.lt.s32.totalorder %v1074_v36, %v463_v30  ;;  %vm1271_vm1 = vmor %vm591_vm10, %vm592_vm11 }
  0xb1   :  { %v232_v3 = vpop.f32.mrf.mxu2  ;;  %v338_v42 = vsel %vm1180_vm3, %v1055_v25, %v334_v23  ;;  %v589_v25 = vmul.f32 %v1125_v58, %v588_v34  ;;  %vm1258_vm15 = vcmp.eq.f32.partialorder %v537_v56, 8.507059e+37  ;;  %vm1263_vm0 = vcmp.lt.s32.totalorder %v1074_v36, %v560_v32 }
  0xb2   :  { %v248_v4 = vpop.f32.mrf.mxu3  ;;  %v1248_v2 = vsel %vm1202_vm5, %v342_v43, %v338_v42  ;;  %v540_v24 = vor.u32 1.1754944e-38, %v539_v60  ;;  %v595_v26 = vand.u32 2147483647, %v1065_v33  ;;  %vm632_vm3 = vweird.f32 %v1187_v35 }
  0xb4   :  { %vm596_vm2 = vcmp.eq.f32.partialorder %v595_v26, 8.507059e+37 }
  0xb6   :  { %617 = vmax.xlane.f32.xlu1 %v616_v5 }
 0x108   :  { %v408_v63 = vpop.xlane.xlu1 %407  ;;  %v309_v0 = vpop.xlane.xlu0 %308 }
 0x109   :  { %v409_v3 = vsel %vm1098_vm7, %v408_v63, 0.0  ;;  %v310_v4 = vsel %vm1107_vm8, %v309_v0, 0.0  ;;  %v280_v5 = vpop.xlane.xlu2 %279 }
 0x10a   :  { %v410_v6 = vrot.slane %v409_v3, 4  ;;  %v311_v7 = vrot.slane %v310_v4, 4  ;;  %v281_v8 = vsel %vm1107_vm8, %v280_v5, 0.0  ;;  %vm534_vm8 = vweird.f32 %v1095_v48 }
 0x10b   :  { %v282_v12 = vrot.slane %v281_v8, 4  ;;  %vm1237_vm13 = vmor %vm533_vm6, %vm534_vm8  ;;  %vm652_vm8 = vcmask 0  }
 0x10c   :  { %v411_v20 = vadd.f32 %v410_v6, %v409_v3  ;;  %v312_v21 = vadd.f32 %v311_v7, %v310_v4  ;;  %v590_v3 = vadd.f32 %v1125_v58, %v589_v25  ;;  %v1256_v4 = vpop.eup %753  ;;  %v536_v19 = vsel %vm1237_vm13, %v1095_v48, %v532_v52 }
 0x10d   :  { %v283_v31 = vadd.f32 %v282_v12, %v281_v8  ;;  %v1294_v42 = vsel %vm1258_vm15, %v540_v24, %v536_v19 }
 0x10e   :  { %v412_v40 = vrot.slane %v411_v20, 2  ;;  %v313_v41 = vrot.slane %v312_v21, 2  ;;  %v594_v48 = vsel %vm1271_vm1, %v1125_v58, %v590_v3 }
 0x10f   :  { %v284_v45 = vrot.slane %v283_v31, 2 }
 0x110   :  { %v507_v17 = vpop.xlane.xlu0 %506  ;;  %v413_v59 = vadd.f32 %v412_v40, %v411_v20  ;;  %v314_v61 = vadd.f32 %v313_v41, %v312_v21  ;;  %v597_v20 = vand.u32 2147483648, %v1065_v33  ;;  %v628_v33 = vmul.f32 %v1256_v4, %v1187_v35 }
 0x111   :  { %v508_v16 = vsel %vm1115_vm9, %v507_v17, 0.0  ;;  %v379_v44 = vpop.xlane.xlu2 %378  ;;  %v285_v1 = vadd.f32 %v284_v45, %v283_v31 }
 0x112   :  { %v380_v46 = vsel %vm1098_vm7, %v379_v44, 0.0  ;;  %v509_v47 = vrot.slane %v508_v16, 4  ;;  %vm1224_vm7 = vcmp.lt.s32.totalorder %v1074_v36, %v364_v54  ;;  %v1244_v54 = vsel %vm1192_vm4, %v441_v38, %v437_v18 }
 0x113   :  { %v381_v50 = vrot.slane %v380_v46, 4  ;;  %v414_v11 = vrot.slane %v413_v59, 1  ;;  %v315_v12 = vrot.slane %v314_v61, 1  ;;  %v286_v27 = vrot.slane %v285_v1, 1 }
 0x114   :  { %v510_v5 = vadd.f32 %v509_v47, %v508_v16  ;;  %v598_v39 = vor.u32 1.1754944e-38, %v597_v20  ;;  %v629_v62 = vsub.f32 1.0, %v628_v33  ;;  %vm633_vm4 = vweird.f32 %v1256_v4 }
 0x115   :  { %v382_v29 = vadd.f32 %v381_v50, %v380_v46  ;;  %v415_v18 = vadd.f32 %v414_v11, %v413_v59  ;;  %v316_v37 = vadd.f32 %v315_v12, %v314_v61  ;;  %v287_v55 = vadd.f32 %v286_v27, %v285_v1  ;;  %vm1334_vm5 = vmor %vm632_vm3, %vm633_vm4 }
 0x116   :  { %v511_v30 = vrot.slane %v510_v5, 2  ;;  %v1303_v50 = vsel %vm596_vm2, %v598_v39, %v594_v48 }
 0x117   :  { %v383_v31 = vrot.slane %v382_v29, 2  ;;  %v416_v45 = vmul.f32 %v415_v18, %v1104_v51  ;;  %v317_v46 = vmul.f32 %v316_v37, %v1111_v53  ;;  %v1313_v8 = vmul.f32 %v1111_v53, %v287_v55 }
 0x118   :  { %v321_v14 = vpop.xlane.xlu0 %320  ;;  %v512_v43 = vadd.f32 %v511_v30, %v510_v5 }
 0x119   :  { %v420_v13 = vpop.xlane.xlu1 %419  ;;  %v478_v10 = vpop.xlane.xlu2 %477  ;;  %v322_v23 = vsel %vm1231_vm12, %v321_v14, 0.0  ;;  %v384_v16 = vadd.f32 %v383_v31, %v382_v29  ;;  %v345_v26 = vadd.f32 1.0, %v317_v46  ;;  %v444_v33 = vadd.f32 1.0, %v416_v45 }
 0x11a   :  { %v421_v21 = vsel %vm1224_vm7, %v420_v13, 0.0  ;;  %v479_v28 = vsel %vm1115_vm9, %v478_v10, 0.0  ;;  %v323_v34 = vrot.slane %v322_v23, 4  ;;  %vm1297_vm9 = vcmp.lt.s32.totalorder %v1074_v36, %v562_v9 }
 0x11b   :  { %v422_v15 = vrot.slane %v421_v21, 4  ;;  %v480_v32 = vrot.slane %v479_v28, 4  ;;  %v513_v3 = vrot.slane %v512_v43, 1  ;;  %v385_v5 = vrot.slane %v384_v16, 1 }
 0x11c   :  { %v324_v41 = vadd.f32 %v323_v34, %v322_v23 }
 0x11d   :  { %v423_v38 = vadd.f32 %v422_v15, %v421_v21  ;;  %v481_v40 = vadd.f32 %v480_v32, %v479_v28  ;;  %v630_v21 = vmul.f32 %v1256_v4, %v629_v62  ;;  %v514_v10 = vadd.f32 %v513_v3, %v512_v43 }
 0x11e   :  { %v325_v22 = vrot.slane %v324_v41, 2  ;;  %v386_v23 = vadd.f32 %v385_v5, %v384_v16  ;;  %v636_v28 = vand.u32 2147483647, %v1187_v35 }
 0x11f   :  { %v424_v17 = vrot.slane %v423_v38, 2  ;;  %v482_v44 = vrot.slane %v481_v40, 2 }
 0x120   :  { %v606_v52 = vpop.xlane.xlu0 %605  ;;  %v326_v59 = vadd.f32 %v325_v22, %v324_v41  ;;  %v402_v39 = vmul.f32 %v1104_v51, %v386_v23  ;;  %v638_v41 = vand.u32 2147483648, %v1187_v35  ;;  %vm1340_vm6 = vcmp.eq.f32.partialorder %v636_v28, 8.507059e+37 }
 0x121   :  { %v425_v25 = vadd.f32 %v424_v17, %v423_v38  ;;  %v519_v47 = vpop.xlane.xlu1 %518  ;;  %v483_v56 = vadd.f32 %v482_v44, %v481_v40  ;;  %v577_v61 = vpop.xlane.xlu2 %576  ;;  %v607_v1 = vsel %vm1263_vm0, %v606_v52, 0.0  ;;  %v631_v40 = vadd.f32 %v1256_v4, %v630_v21 }
 0x122   :  { %v520_v36 = vsel %vm1251_vm14, %v519_v47, 0.0  ;;  %v578_v60 = vsel %vm1263_vm0, %v577_v61, 0.0  ;;  %v327_v29 = vrot.slane %v326_v59, 1  ;;  %v608_v11 = vrot.slane %v607_v1, 4 }
 0x123   :  { %v426_v63 = vrot.slane %v425_v25, 1  ;;  %v521_v0 = vrot.slane %v520_v36, 4  ;;  %v579_v6 = vrot.slane %v578_v60, 4  ;;  %v484_v12 = vrot.slane %v483_v56, 1 }
 0x124   :  { %v328_v13 = vadd.f32 %v327_v29, %v326_v59  ;;  %v609_v7 = vadd.f32 %v608_v11, %v607_v1  ;;  %v346_v47 = vsub.f32 %v345_v26, %v1313_v8  ;;  %v445_v59 = vsub.f32 %v444_v33, %v402_v39 }
 0x125   :  { %v427_v57 = vadd.f32 %v426_v63, %v425_v25  ;;  %v522_v9 = vadd.f32 %v521_v0, %v520_v36  ;;  %v580_v14 = vadd.f32 %v579_v6, %v578_v60  ;;  %v485_v31 = vadd.f32 %v484_v12, %v483_v56 }
 0x126   :  { %v344_v24 = vmul.f32 %v1248_v2, %v328_v13  ;;  %v610_v15 = vrot.slane %v609_v7, 2  ;;  %v515_v2 = vmul.f32 %v514_v10, %v1219_v49  ;;  %v639_v56 = vor.u32 1.1754944e-38, %v638_v41 }
 0x127   :  { %v443_v19 = vmul.f32 %v1244_v54, %v427_v57  ;;  %v523_v20 = vrot.slane %v522_v9, 2  ;;  %v581_v53 = vrot.slane %v580_v14, 2  ;;  %v501_v51 = vmul.f32 %v1219_v49, %v485_v31 }
 0x128   :  { %v347_v32 = vadd.f32 1.0, %v344_v24  ;;  %v611_v37 = vadd.f32 %v610_v15, %v609_v7  ;;  %v543_v52 = vadd.f32 1.0, %v515_v2  ;;  %v635_v49 = vsel %vm1334_vm5, %v1256_v4, %v631_v40 }
 0x129   :  { %v524_v27 = vadd.f32 %v523_v20, %v522_v9  ;;  %v618_v48 = vpop.xlane.xlu1 %617  ;;  %v446_v30 = vadd.f32 1.0, %v443_v19  ;;  %v582_v18 = vadd.f32 %v581_v53, %v580_v14  ;;  %v349_v5 = vmax.f32 %v346_v47, 0.0 }
 0x12a   :  { %v619_v54 = vsel %vm1297_vm9, %v618_v48, 0.0  ;;  %v612_v17 = vrot.slane %v611_v37, 1  ;;  %v348_v44 = vsub.f32 %v347_v32, %v1313_v8  ;;  %v640_v4 = vsel %vm1340_vm6, %v639_v56, %v635_v49 }
 0x12b   :  { %v525_v34 = vrot.slane %v524_v27, 1  ;;  %v620_v38 = vrot.slane %v619_v54, 4  ;;  %v447_v16 = vsub.f32 %v446_v30, %v402_v39  ;;  %v583_v46 = vrot.slane %v582_v18, 1 }
 0x12c   :  { %v613_v35 = vadd.f32 %v612_v17, %v611_v37  ;;  %v350_v0 = vmax.f32 %v348_v44, 0.0  ;;  %v448_v29 = vmax.f32 %v445_v59, 0.0  ;;  %v352_v19 = vstv %s260_s26 }
 0x12d   :  { %v526_v55 = vadd.f32 %v525_v34, %v524_v27  ;;  %v621_v43 = vadd.f32 %v620_v38, %v619_v54  ;;  %v449_v63 = vmax.f32 %v447_v16, 0.0  ;;  %v584_v1 = vadd.f32 %v583_v46, %v582_v18 }
 0x12e   :  { %v614_v61 = vmul.f32 %v613_v35, %v1303_v50  ;;  %v351_v12 = vadd.f32 %v350_v0, %v349_v5  ;;  %v451_v20 = vstv %s361_s27  ;;  %v550_v23 = vstv %s460_s4 }
 0x12f   :  { %v542_v45 = vmul.f32 %v1294_v42, %v526_v55  ;;  %v622_v25 = vrot.slane %v621_v43, 2  ;;  %v544_v42 = vsub.f32 %v543_v52, %v501_v51  ;;  %v450_v11 = vadd.f32 %v449_v63, %v448_v29 }
 0x130   :  { %v642_v8 = vadd.f32 1.0, %v614_v61  ;;  %v600_v13 = vmul.f32 %v1303_v50, %v584_v1  ;;  %v353_v53 = vmul.f32 %v352_v19, %v351_v12  ;;  %v649_v48 = vstv %s559_s28 }
 0x131   :  { %v545_v36 = vadd.f32 1.0, %v542_v45  ;;  %v623_v62 = vadd.f32 %v622_v25, %v621_v43  ;;  %v547_v9 = vmax.f32 %v544_v42, 0.0  ;;  %v452_v26 = vmul.f32 %v451_v20, %v450_v11 }
 0x132   :  { %v643_v7 = vsub.f32 %v642_v8, %v600_v13 }
 0x133   :  { %v546_v60 = vsub.f32 %v545_v36, %v501_v51  ;;  %v624_v3 = vrot.slane %v623_v62, 1  ;;  %v453_v30 = vadd.f32 %v452_v26, %v353_v53 }
 0x134   :  { %v646_v27 = vmax.f32 %v643_v7, 0.0 }
 0x135   :  { %v548_v6 = vmax.f32 %v546_v60, 0.0  ;;  %v625_v57 = vadd.f32 %v624_v3, %v623_v62 }
 0x137   :  { %v641_v14 = vmul.f32 %v640_v4, %v625_v57  ;;  %v549_v10 = vadd.f32 %v548_v6, %v547_v9 }
 0x139   :  { %v644_v21 = vadd.f32 1.0, %v641_v14  ;;  %v551_v28 = vmul.f32 %v550_v23, %v549_v10 }
 0x13b   :  { %v645_v24 = vsub.f32 %v644_v21, %v600_v13  ;;  %v552_v50 = vadd.f32 %v551_v28, %v453_v30 }
 0x13d   :  { %v647_v15 = vmax.f32 %v645_v24, 0.0 }
 0x13f   :  { %v648_v31 = vadd.f32 %v647_v15, %v646_v27 }
 0x141   :  { %v650_v32 = vmul.f32 %v649_v48, %v648_v31 }
 0x143   :  { %v651_v54 = vadd.f32 %v650_v32, %v552_v50 }
 0x145   :  { %653 = vst.msk [vmem:[#allocation8] sm:$0x1] %vm652_vm8, %v651_v54 }
 0x146   :  { %664 = dma.vmem_to_hbm [thread:$0]  %s660_s29, 16, %s662_s10, [#allocation9]  }
 0x147   :  { %841 = dma.done.wait [#allocation9], 16  }
 0x148   :  { %842 = vsyncadd [#allocation9], 4294967280 }
 0x149   :  { %669 = vsyncpa [#allocation9], 1 }

</bundles_post_ra>
